<compile_context>
chip_gen: v7x
topology: tpu7x:2x2x1
jax: 0.10.0
libtpu: 0.0.40
codegen_flags: <defaults>
</compile_context>

<pallas_src>
import functools

import jax
import jax.numpy as jnp
import numpy as np
from jax.experimental import pallas as pl
from jax.experimental.pallas import tpu as pltpu

NEG_SLOPE = 0.2        # LeakyReLU negative slope (module default)
MASK_BIAS = -1e30      # additive mask value for non-edges


# ---------------------------------------------------------------------------
# Kernel 1: projection.  One MXU matmul per row tile:
#   zs = x @ [W | W@a_i | W@a_j]   -> z (features), si (dest logits),
#                                     sjT (source logits, transposed).
# ---------------------------------------------------------------------------
def project_kernel(x_ref, w_ref, z_ref, si_ref, sjT_ref, *, heads, fout,
                   mxu_dtype):
    hf = heads * fout
    x = x_ref[...].astype(mxu_dtype)
    w = w_ref[...].astype(mxu_dtype)
    zs = jnp.dot(x, w, preferred_element_type=jnp.float32)   # [tm, hf + 2H]
    z_ref[...] = zs[:, :hf].astype(z_ref.dtype)
    si_ref[...] = zs[:, hf:hf + heads]                        # [tm, H]
    sjT_ref[...] = zs[:, hf + heads:hf + 2 * heads].T         # [H, tm]


# ---------------------------------------------------------------------------
# Kernel 2: tiled masked softmax + aggregation (flash-style online softmax
# over source-column blocks; destination-row tiles are the parallel axis).
# ---------------------------------------------------------------------------
def attn_kernel(si_ref, sjT_ref, z_ref, bias_ref, out_ref,
                m_scr, l_scr, acc_scr, *, heads, fout, neg_slope,
                apply_elu, mean_heads, log_softmax, mxu_dtype, approx_recip):
    j = pl.program_id(1)

    @pl.when(j == 0)
    def _init():
        m_scr[...] = jnp.full_like(m_scr, -jnp.inf)
        l_scr[...] = jnp.zeros_like(l_scr)
        acc_scr[...] = jnp.zeros_like(acc_scr)

    si = si_ref[...]                                # [tm, H]   dest logit term
    sjT = sjT_ref[...]                              # [H, tn]   source logit term
    z = z_ref[...]                                  # [tn, H*Fout]
    bias = bias_ref[...].astype(jnp.float32)        # [tm, tn]  0 / -1e30

    for h in range(heads):                          # static unroll (H small)
        e = si[:, h:h + 1] + sjT[h:h + 1, :]        # [tm, tn]
        e = jnp.maximum(e, neg_slope * e)           # LeakyReLU (slope in (0,1))
        e = e + bias                                # edge mask (additive)

        m_prev = m_scr[:, h:h + 1]                  # [tm, 1]
        m_new = jnp.maximum(m_prev, jnp.max(e, axis=-1, keepdims=True))
        corr = jnp.exp(m_prev - m_new)              # rescale running stats
        p = jnp.exp(e - m_new)                      # masked entries underflow to 0

        l_scr[:, h:h + 1] = corr * l_scr[:, h:h + 1] + jnp.sum(
            p, axis=-1, keepdims=True)
        m_scr[:, h:h + 1] = m_new

        # aggregation matmul: alpha never materialized, scale at finalize.
        z_h = z[:, h * fout:(h + 1) * fout].astype(mxu_dtype)      # [tn, Fout]
        pz = jnp.dot(p.astype(mxu_dtype), z_h,
                     preferred_element_type=jnp.float32)            # [tm, Fout]
        acc_scr[:, h * fout:(h + 1) * fout] = (
            corr * acc_scr[:, h * fout:(h + 1) * fout] + pz)

    @pl.when(j == pl.num_programs(1) - 1)
    def _finalize():
        m = m_scr[...]                              # [tm, H]
        l = l_scr[...]                              # [tm, H]  (always > 0)
        r = pl.reciprocal(l, approx=True) if approx_recip else 1.0 / l
        # rows with no in-edges at all (m stuck near the -1e30 mask) output 0
        inv = jnp.where(m > -1e20, r, 0.0)          # [tm, H]

        if mean_heads:
            out = acc_scr[:, 0:fout] * inv[:, 0:1]
            for h in range(1, heads):
                out = out + acc_scr[:, h * fout:(h + 1) * fout] * inv[:, h:h + 1]
            out = out * (1.0 / heads)               # [tm, C]
            if apply_elu:
                out = jnp.where(out > 0, out,
                                jnp.exp(jnp.minimum(out, 0.0)) - 1.0)
            if log_softmax:                         # fused final log_softmax
                mm = jnp.max(out, axis=-1, keepdims=True)
                sh = out - mm
                out = sh - jnp.log(jnp.sum(jnp.exp(sh), axis=-1, keepdims=True))
            out_ref[...] = out.astype(out_ref.dtype)
        else:
            parts = [acc_scr[:, h * fout:(h + 1) * fout] * inv[:, h:h + 1]
                     for h in range(heads)]
            out = jnp.concatenate(parts, axis=1)    # [tm, H*Fout] lane-dense
            if apply_elu:
                out = jnp.where(out > 0, out,
                                jnp.exp(jnp.minimum(out, 0.0)) - 1.0)
            out_ref[...] = out.astype(out_ref.dtype)   # one full-width store


# ---------------------------------------------------------------------------
# Wrappers
# ---------------------------------------------------------------------------
def _pick_tile(n, pref):
    """Largest multiple of 128 that divides n and is <= pref, else n (full).
    128-alignment keeps every lane-dim BlockSpec legal under the (8,128) rule."""
    if n % 128 == 0 and pref >= 128:
        t = min(pref, n)
        t -= t % 128
        while t >= 128:
            if n % t == 0:
                return t
            t -= 128
    return n


def gat_layer(x, w_cat, bias, *, heads, fout, apply_elu, mean_heads,
              log_softmax, precise, block_rows, block_cols, proj_rows):
    """x: [N, Fin], w_cat: [Fin, H*Fout + 2H], bias: [N, N] (bf16, 0/-1e30)."""
    N, fin = x.shape
    hf = heads * fout
    mxu_dtype = jnp.float32 if precise else jnp.bfloat16
    z_dtype = jnp.float32 if precise else jnp.bfloat16

    # --- 1) projection (row-tiled, parallel) -------------------------------
    tp = _pick_tile(N, proj_rows)
    z, si, sjT = pl.pallas_call(
        functools.partial(project_kernel, heads=heads, fout=fout,
                          mxu_dtype=mxu_dtype),
        grid=(N // tp,),
        in_specs=[pl.BlockSpec((tp, fin), lambda i: (i, 0)),
                  pl.BlockSpec((fin, hf + 2 * heads), lambda i: (0, 0))],
        out_specs=(pl.BlockSpec((tp, hf), lambda i: (i, 0)),
                   pl.BlockSpec((tp, heads), lambda i: (i, 0)),
                   pl.BlockSpec((heads, tp), lambda i: (0, i))),
        out_shape=(jax.ShapeDtypeStruct((N, hf), z_dtype),
                   jax.ShapeDtypeStruct((N, heads), jnp.float32),
                   jax.ShapeDtypeStruct((heads, N), jnp.float32)),
        compiler_params=pltpu.CompilerParams(
            dimension_semantics=("parallel",)),
    )(x, w_cat)

    # --- 2) tiled attention + aggregation ----------------------------------
    tm = _pick_tile(N, block_rows)   # dest rows  (parallel axis)
    tn = _pick_tile(N, block_cols)   # src cols   (reduction / streamed axis)
    out_dim = fout if mean_heads else hf

    return pl.pallas_call(
        functools.partial(attn_kernel, heads=heads, fout=fout,
                          neg_slope=NEG_SLOPE, apply_elu=apply_elu,
                          mean_heads=mean_heads, log_softmax=log_softmax,
                          mxu_dtype=mxu_dtype, approx_recip=not precise),
        grid=(N // tm, N // tn),
        in_specs=[pl.BlockSpec((tm, heads), lambda i, j: (i, 0)),
                  pl.BlockSpec((heads, tn), lambda i, j: (0, j)),
                  pl.BlockSpec((tn, hf), lambda i, j: (j, 0)),
                  pl.BlockSpec((tm, tn), lambda i, j: (i, j))],
        out_specs=pl.BlockSpec((tm, out_dim), lambda i, j: (i, 0)),
        out_shape=jax.ShapeDtypeStruct((N, out_dim), jnp.float32),
        scratch_shapes=[pltpu.VMEM((tm, heads), jnp.float32),   # running max
                        pltpu.VMEM((tm, heads), jnp.float32),   # running denom
                        pltpu.VMEM((tm, hf), jnp.float32)],     # running acc
        compiler_params=pltpu.CompilerParams(
            dimension_semantics=("parallel", "arbitrary")),
    )(si, sjT, z, bias)


def gat_forward(x, bias, layers, *, precise,
                block_rows=256, block_cols=512, proj_rows=256):
    """Full GAT.forward.  Default tile sizes are sized for v7x's 64 MiB VMEM
    (~0.5 MiB working set per step); re-sweep per chip generation."""
    n_layers = len(layers)
    for l, (w_cat, heads, fout) in enumerate(layers):
        last = (l == n_layers - 1)
        x = gat_layer(x, w_cat, bias, heads=heads, fout=fout,
                      apply_elu=not last, mean_heads=last, log_softmax=last,
                      precise=precise, block_rows=block_rows,
                      block_cols=block_cols, proj_rows=proj_rows)
    return x


# ---------------------------------------------------------------------------
# Parameter init (glorot/xavier uniform, deterministic) + preprocessing
# ---------------------------------------------------------------------------
def glorot(key, shape, fan_in, fan_out):
    lim = float(np.sqrt(6.0 / (fan_in + fan_out)))
    return jax.random.uniform(key, shape, jnp.float32, -lim, lim)


def init_layer(key, fin, fout, heads):
    k1, k2, k3 = jax.random.split(key, 3)
    W = glorot(k1, (fin, heads * fout), fin, heads * fout)   # lin (no bias)
    ai = glorot(k2, (heads, fout), heads, fout)              # att_i
    aj = glorot(k3, (heads, fout), heads, fout)              # att_j
    return W, ai, aj


def preprocess_layer(W, ai, aj, fin, fout, heads):
    """Fold the attention vectors into the feature matmul:
    si_h = x @ (W_h @ a_i_h), sj_h = x @ (W_h @ a_j_h)."""
    W_h = W.reshape(fin, heads, fout)                     # [Fin, H, Fout]
    wa_i = jnp.einsum('fho,ho->fh', W_h, ai)              # [Fin, H]
    wa_j = jnp.einsum('fho,ho->fh', W_h, aj)              # [Fin, H]
    return jnp.concatenate([W, wa_i, wa_j], axis=1)       # [Fin, H*Fout + 2H]


# ---------------------------------------------------------------------------
# Pure-JAX edge-list reference (PyG semantics, f32) for correctness check
# ---------------------------------------------------------------------------
def gat_layer_ref(x, w, ai, aj, src, dst, N, apply_elu):
    z = jnp.einsum('nf,hfo->nho', x, w)                   # [N, H, Fout]
    si = jnp.sum(z * ai[None], axis=-1)                   # [N, H]
    sj = jnp.sum(z * aj[None], axis=-1)
    e = si[dst] + sj[src]                                 # [E, H]
    e = jnp.where(e >= 0, e, NEG_SLOPE * e)
    emax = jax.ops.segment_max(e, dst, num_segments=N)
    emax = jnp.where(jnp.isfinite(emax), emax, 0.0)
    p = jnp.exp(e - emax[dst])
    denom = jax.ops.segment_sum(p, dst, num_segments=N)
    denom = jnp.where(denom > 0, denom, 1.0)
    alpha = p / denom[dst]
    msg = z[src] * alpha[:, :, None]
    out = jax.ops.segment_sum(msg, dst, num_segments=N)   # [N, H, Fout]
    if apply_elu:
        out = jnp.where(out > 0, out, jnp.exp(jnp.minimum(out, 0.0)) - 1.0)
    return out


def gat_forward_ref(x, src, dst, N, raw_params):
    nl = len(raw_params)
    for l, (W, ai, aj, fin, fout, h) in enumerate(raw_params):
        w = W.reshape(fin, h, fout).transpose(1, 0, 2)    # [H, Fin, Fout]
        out = gat_layer_ref(x, w, ai, aj, src, dst, N, apply_elu=(l != nl - 1))
        if l == nl - 1:
            x = out.mean(axis=1)
        else:
            x = out.reshape(N, -1)                        # head-major concat
    return jax.nn.log_softmax(x, axis=-1)


# ---------------------------------------------------------------------------
if __name__ == "__main__":
    key = jax.random.PRNGKey(0)
    N = 256               # nodes (2x2 grid of 128x128 tiles -> exercises the
                          # online softmax and the parallel row axis)
    in_feats = 32
    num_hidden = 16
    num_classes = 8
    heads = [2, 2, 2]
    num_layers = 3

    kx, ke1, ke2, kp = jax.random.split(key, 4)
    x = jax.random.normal(kx, (N, in_feats), jnp.float32)

    # Synthetic graph: random edges + self loops; dense additive mask in bf16
    # (exact: only 0 / -1e30), halving the dominant streamed input.
    E = 1024
    src0 = jax.random.randint(ke1, (E,), 0, N)
    dst0 = jax.random.randint(ke2, (E,), 0, N)
    src0 = jnp.concatenate([src0, jnp.arange(N)])
    dst0 = jnp.concatenate([dst0, jnp.arange(N)])
    adj = jnp.zeros((N, N), jnp.float32).at[dst0, src0].set(1.0)  # adj[i,j]=1 for j->i
    bias = ((adj - 1.0) * (-MASK_BIAS)).astype(jnp.bfloat16)      # 0 / -1e30

    # De-duplicated edge list (what the dense mask represents) for the reference.
    dst_np, src_np = np.nonzero(np.asarray(adj))
    src = jnp.asarray(src_np, jnp.int32)
    dst = jnp.asarray(dst_np, jnp.int32)

    dims_in = [in_feats, num_hidden * heads[0], num_hidden * heads[1]]
    dims_out = [num_hidden, num_hidden, num_classes]

    raw_params = []
    kern_layers = []
    for l in range(num_layers):
        kp, sub = jax.random.split(kp)
        W, ai, aj = init_layer(sub, dims_in[l], dims_out[l], heads[l])
        raw_params.append((W, ai, aj, dims_in[l], dims_out[l], heads[l]))
        w_cat = preprocess_layer(W, ai, aj, dims_in[l], dims_out[l], heads[l])
        kern_layers.append((w_cat, heads[l], dims_out[l]))

    ref = gat_forward_ref(x, src, dst, N, raw_params)

    # 1) strict check: f32 MXU operands + exact reciprocal -> validates the
    #    graph semantics (masking, per-dest softmax, heads, ELU, log_softmax).
    out_f32 = jax.block_until_ready(
        gat_forward(x, bias, kern_layers, precise=True,
                    block_rows=128, block_cols=128, proj_rows=128))
    np.testing.assert_allclose(np.asarray(out_f32), np.asarray(ref),
                               rtol=1e-3, atol=1e-3)

    # 2) perf configuration: bf16 MXU operands + approx reciprocal (the path
    #    you would run on real graphs).  Loose tolerance: the difference vs
    #    the f32 reference is pure bf16 rounding compounded over 3 layers;
    #    structural bugs would show up as O(1) errors.
    out_bf16 = jax.block_until_ready(
        gat_forward(x, bias, kern_layers, precise=False,
                    block_rows=128, block_cols=128, proj_rows=128))
    np.testing.assert_allclose(np.asarray(out_bf16), np.asarray(ref),
                               rtol=2e-1, atol=2e-1)

    print("KERNEL_OK")
</pallas_src>

<mosaic_0001>
module attributes {stable_mosaic.version = 11 : i64} {
  func.func @project_kernel(%arg0: i32, %arg1: memref<128x32xf32, #tpu.memory_space<vmem>>, %arg2: memref<32x36xf32, #tpu.memory_space<vmem>>, %arg3: memref<128x32xf32, #tpu.memory_space<vmem>>, %arg4: memref<128x2xf32, #tpu.memory_space<vmem>>, %arg5: memref<2x128xf32, #tpu.memory_space<vmem>>) attributes {dimension_semantics = [#tpu.dimension_semantics<parallel>], iteration_bounds = array<i64: 2>, scalar_prefetch = 0 : i64, scratch_operands = 0 : i64, tpu.core_type = #tpu.core_type<tc>, window_params = [{transform_indices = @transform_0, window_bounds = array<i64: 128, 32>}, {pipeline_mode = #tpu.pipeline_mode<synchronous>, transform_indices = @transform_1, window_bounds = array<i64: 32, 36>}, {transform_indices = @transform_2, window_bounds = array<i64: 128, 32>}, {transform_indices = @transform_3, window_bounds = array<i64: 128, 2>}, {transform_indices = @transform_4, window_bounds = array<i64: 2, 128>}]} {
    %c0 = arith.constant 0 : index
    %c0_0 = arith.constant 0 : index
    %0 = vector.load %arg1[%c0, %c0_0] : memref<128x32xf32, #tpu.memory_space<vmem>>, vector<128x32xf32>
    %c0_1 = arith.constant 0 : index
    %c0_2 = arith.constant 0 : index
    %1 = vector.load %arg2[%c0_1, %c0_2] : memref<32x36xf32, #tpu.memory_space<vmem>>, vector<32x36xf32>
    %cst = arith.constant dense<0.000000e+00> : vector<128x36xf32>
    %2 = tpu.matmul %0, %1, %cst {dimension_numbers = #tpu.dot_dimension_numbers<[1], [0], [0], [1], [0, 0, 1, 1], [], []>} : vector<128x32xf32>, vector<32x36xf32>, vector<128x36xf32> -> vector<128x36xf32>
    %3 = vector.extract_strided_slice %2 {offsets = [0, 0], sizes = [128, 32], strides = [1, 1]} : vector<128x36xf32> to vector<128x32xf32>
    %c0_3 = arith.constant 0 : index
    %c0_4 = arith.constant 0 : index
    %4 = vector.load %arg3[%c0_3, %c0_4] : memref<128x32xf32, #tpu.memory_space<vmem>>, vector<128x32xf32>
    tpu.vector_store %arg3[%c0_3, %c0_4], %3 {strides = array<i32>} : memref<128x32xf32, #tpu.memory_space<vmem>>, vector<128x32xf32>,
    %5 = vector.extract_strided_slice %2 {offsets = [0, 32], sizes = [128, 2], strides = [1, 1]} : vector<128x36xf32> to vector<128x2xf32>
    %c0_5 = arith.constant 0 : index
    %c0_6 = arith.constant 0 : index
    %6 = vector.load %arg4[%c0_5, %c0_6] : memref<128x2xf32, #tpu.memory_space<vmem>>, vector<128x2xf32>
    tpu.vector_store %arg4[%c0_5, %c0_6], %5 {strides = array<i32>} : memref<128x2xf32, #tpu.memory_space<vmem>>, vector<128x2xf32>,
    %7 = vector.extract_strided_slice %2 {offsets = [0, 34], sizes = [128, 2], strides = [1, 1]} : vector<128x36xf32> to vector<128x2xf32>
    %8 = tpu.transpose %7, [1, 0] : vector<128x2xf32> -> vector<2x128xf32>
    %c0_7 = arith.constant 0 : index
    %c0_8 = arith.constant 0 : index
    %9 = vector.load %arg5[%c0_7, %c0_8] : memref<2x128xf32, #tpu.memory_space<vmem>>, vector<2x128xf32>
    tpu.vector_store %arg5[%c0_7, %c0_8], %8 {strides = array<i32>} : memref<2x128xf32, #tpu.memory_space<vmem>>, vector<2x128xf32>,
    return
  }
  func.func @transform_0(%arg0: i32) -> (i32, i32) {
    %c0_i32 = arith.constant 0 : i32
    %c0_i32_0 = arith.constant 0 : i32
    return %arg0, %c0_i32 : i32, i32
  }
  func.func @transform_1(%arg0: i32) -> (i32, i32) {
    %c0_i32 = arith.constant 0 : i32
    %c0_i32_0 = arith.constant 0 : i32
    %c0_i32_1 = arith.constant 0 : i32
    return %c0_i32, %c0_i32_0 : i32, i32
  }
  func.func @transform_2(%arg0: i32) -> (i32, i32) {
    %c0_i32 = arith.constant 0 : i32
    %c0_i32_0 = arith.constant 0 : i32
    return %arg0, %c0_i32 : i32, i32
  }
  func.func @transform_3(%arg0: i32) -> (i32, i32) {
    %c0_i32 = arith.constant 0 : i32
    %c0_i32_0 = arith.constant 0 : i32
    return %arg0, %c0_i32 : i32, i32
  }
  func.func @transform_4(%arg0: i32) -> (i32, i32) {
    %c0_i32 = arith.constant 0 : i32
    %c0_i32_0 = arith.constant 0 : i32
    return %c0_i32, %arg0 : i32, i32
  }
}

</mosaic_0001>

<bundles_post_ra>
// kernel: tpu_custom_call.1
= control target key start
LH: loop header
LB: loop body
LE: loop exit
PB: predicated region body
PF: predicated region fallthrough
CT: control target
= control target key end

     0   :  { %10 = vsyncpa [#allocation3], 0  ;;  %s1226_s0 = inlined_call_operand.vmem [shape: f32[256,32], index: 0, kind: input, shape index: {}]   ;;  %s1227_s1 = inlined_call_operand.vmem [shape: f32[32,36], index: 1, kind: input, shape index: {}]   ;;  %s1228_s2 = inlined_call_operand.vmem [shape: f32[256,32], index: 2, kind: output, shape index: {0}]   ;;  %s1229_s3 = inlined_call_operand.vmem [shape: f32[256,2], index: 3, kind: output, shape index: {1}]   ;;  %s1230_s4 = inlined_call_operand.hbm [shape: f32[2,256], index: 4, kind: output, shape index: {2}]  }
   0x1   :  { %12 = vsyncpa [#allocation3 + $0x1], 0  ;;  %s986_s15 = smov 0   ;;  %s988_s16 = smov 0  }
   0x2   :  { %s990_s17 = smov 0   ;;  %s992_s18 = smov 0  }
   0x3 LB: > { %s1007_s19 = sadd.s32 4294967295, %s956_s18   ;;  %s758_s20 = sadd.s32 4294967294, %s956_s18   ;;  %s956_s18 = sphi %s992_s18, %s1236_s18   ;;  %s952_s17 = sphi %s990_s17, %s1235_s17   ;;  %s948_s16 = sphi %s988_s16, %s1234_s16   ;;  %s944_s15 = sphi %s986_s15, %s1233_s15  }
   0x4   : > { %s1011_s21 = sadd.s32 1, %s956_s18   ;;  %s124_s22 = sadd.s32 1, %s952_s17 }
   0x5   : > { %s121_s23 = ssub.s32 %s956_s18, %s1011_s21  ;;  %p134_p0 = scmp.ne.s32.totalorder %s952_s17, %s948_s16 }
   0x6   : > { %p122_p1 = scmp.eq.s32.totalorder %s121_s23, 0  ;;  %p135_p2 = scmp.eq.s32.totalorder %s1007_s19, 1 }
   0x7   : > { %p140_p3 = scmp.ne.s32.totalorder %s948_s16, %s944_s15  ;;  %p141_p4 = scmp.eq.s32.totalorder %s758_s20, 1 }
   0x8   : > { %s1022_s24 = scalar_select %p122_p1, %s952_s17, %s124_s22  }
   0x9   : > { %p1024_p5 = por %p135_p2, %p134_p0  ;;  %p1028_p6 = por %p141_p4, %p140_p3 }
   0xa   : > { %p761_p7 = scmp.ge.s32.totalorder %s956_s18, 1  ;;  %p171_p8 = scmp.lt.s32.totalorder %s956_s18, 3 }
   0xc   : > { %p172_p9 = pnand %p761_p7, %p171_p8 }
   0xd   : > { %v241_v0 = vld [vmem:[%s1227_s1] sm:$0xff] (!%p172_p9)  ;;  %v242_v1 = vld [vmem:[%s1227_s1 + $0x8] sm:$0xff] (!%p172_p9)  ;;  %v243_v2 = vld [vmem:[%s1227_s1 + $0x10] sm:$0xff] (!%p172_p9)  ;;  %s763_s7 = sshll.u32 (!%p172_p9), %s1007_s19, 4  ;;  %vm245_vm0 = vcmask (!%p172_p9), 261120   ;;  %s958_s23 = smov (!%p172_p9), 94  }
   0xe   : > { %175 = sbr.rel (%p172_p9) target bundleno = 520 (0x208), region = 28  ;;  %v841_v3 = vpack.c.bf16 (!%p172_p9), %v242_v1, %v241_v0  ;;  %v244_v4 = vld [vmem:[%s1227_s1 + $0x18] sm:$0xff] (!%p172_p9)  ;;  %p208_p10 = scmp.lt.s32.totalorder (!%p172_p9), %s763_s7, 31  ;;  %vm519_vm1 = vcmask (!%p172_p9), 15360  }
   0xf   : > { %v845_v5 = vpack.c.bf16 (!%p172_p9), %v244_v4, %v243_v2  ;;  %s959_s27 = smov (!%p172_p9), 96   ;;  %s204_s5 = sand.u32 (!%p172_p9), 1, %s948_s16  }
  0x10   : > { %842 = vmatprep.subr.bf16.mxu0 (!%p172_p9), %v841_v3  ;;  %849 = vmatprep.subr.bf16.mxu1 (!%p172_p9), %v841_v3  ;;  %s762_s6 = sshll.u32 (!%p172_p9), %s204_s5, 1  ;;  %s786_s9 = sshll.u32 (!%p172_p9), %s1007_s19, 5 }
  0x11   : > { %844 = vmatpush3.bf16.msra.mxu0 (!%p172_p9), %v841_v3  ;;  %851 = vmatpush3.bf16.msra.mxu1 (!%p172_p9), %v841_v3  ;;  %s1186_s12 = scalar_lea.hbm (!%p172_p9), %s1230_s4, %s786_s9  ;;  %s960_s20 = smov (!%p172_p9), [#allocation2]  }
  0x12   : > { %846 = vmatprep.subr.bf16.mxu0 (!%p172_p9), %v845_v5  ;;  %850 = vmatprep.subr.bf16.mxu1 (!%p172_p9), %v845_v5  ;;  %s898_s19 = sshll.u32 (!%p172_p9), %s960_s20, 4  ;;  %s899_s19 = int_to_ptr.vmem [resolvable:$false] %s898_s19 }
  0x15   : > { %s1238_s7 = smov (!%p208_p10, %s763_s7), 31  ;;  %848 = vmatpush3.bf16.msra.mxu0 %v845_v5  ;;  %852 = vmatpush3.bf16.msra.mxu1 %v845_v5 }
  0x16   : > { %s1047_s10 = sshll.u32 %s1238_s7, 3  ;;  %s206_s7 = scalar_lea.vmem [#allocation2], %s762_s6 }
  0x17   : > { %s1053_s13 = scalar_lea.vmem %s1226_s0, %s1047_s10  ;;  %s1091_s22 = scalar_lea.vmem %s1228_s2, %s1047_s10 }
  0x18   : > { %v225_v6 = vld [vmem:[%s1053_s13] sm:$0xff]  ;;  %v226_v7 = vld [vmem:[%s1053_s13 + $0x8] sm:$0xff]  ;;  %v227_v9 = vld [vmem:[%s1053_s13 + $0x10] sm:$0xff]  ;;  %s1145_s30 = scalar_lea.vmem %s1229_s3, %s1047_s10  ;;  %s649_s8 = sshll.u32 %s206_s7, 4  ;;  %s1181_s8 = int_to_ptr.vmem [resolvable:$true] %s649_s8 }
  0x19   : > { %817 = vmatprep.mubr.msk.f32.mxu0 %vm245_vm0, %v225_v6  ;;  %v233_v8 = vld [vmem:[%s1053_s13 + $0x40] sm:$0xff]  ;;  %v234_v10 = vld [vmem:[%s1053_s13 + $0x48] sm:$0xff]  ;;  %v235_v11 = vld [vmem:[%s1053_s13 + $0x50] sm:$0xff]  ;;  %s894_s14 = scalar_lea.vmem %s1181_s8, 32  ;;  %p901_p0 = scmp.lt.s32.totalorder %s1181_s8, %s899_s19 }
  0x1a   : > { %829 = vmatprep.mubr.msk.f32.mxu1 %vm245_vm0, %v233_v8  ;;  %818 = vmatmul.mubr.msk.f32.vlgmr.msra.gmra.mrb[0].mxu0 %vm245_vm0, %v226_v7  ;;  %v228_v12 = vld [vmem:[%s1053_s13 + $0x18] sm:$0xff]  ;;  %v229_v13 = vld [vmem:[%s1053_s13 + $0x20] sm:$0xff]  ;;  %v230_v16 = vld [vmem:[%s1053_s13 + $0x28] sm:$0xff]  ;;  %p895_p11 = scmp.ne.s32.totalorder %s1181_s8, %s894_s14 }
  0x1b   : > { %820 = vmatprep.mubr.msk.f32.mxu0 %vm245_vm0, %v227_v9  ;;  %830 = vmatmul.mubr.msk.f32.vlgmr.msra.gmra.mrb[0].mxu1 %vm245_vm0, %v234_v10  ;;  %v236_v14 = vld [vmem:[%s1053_s13 + $0x58] sm:$0xff]  ;;  %v237_v15 = vld [vmem:[%s1053_s13 + $0x60] sm:$0xff]  ;;  %v231_v17 = vld [vmem:[%s1053_s13 + $0x30] sm:$0xff] }
  0x1c   : > { %832 = vmatprep.mubr.msk.f32.mxu1 %vm245_vm0, %v235_v11  ;;  %v238_v18 = vld [vmem:[%s1053_s13 + $0x68] sm:$0xff]  ;;  %v239_v19 = vld [vmem:[%s1053_s13 + $0x70] sm:$0xff]  ;;  %v232_v20 = vld [vmem:[%s1053_s13 + $0x38] sm:$0xff]  ;;  %p896_p12 = pnand %p895_p11, %p1024_p5 }
  0x1d   : > { %v240_v21 = vld [vmem:[%s1053_s13 + $0x78] sm:$0xff]  ;;  %s628_s13 = scalar_lea.sflag [#allocation3], %s204_s5 }
  0x1e   : > { %821 = vmatmul.mubr.msk.f32.gmra.mrb[2].mxu0 %vm245_vm0, %v228_v12  ;;  %p897_p13 = pneg %p896_p12 }
  0x1f   : > { %823 = vmatprep.mubr.msk.f32.mxu0 %vm245_vm0, %v229_v13  ;;  %833 = vmatmul.mubr.msk.f32.gmra.mrb[2].mxu1 %vm245_vm0, %v236_v14 }
  0x20   : > { %835 = vmatprep.mubr.msk.f32.mxu1 %vm245_vm0, %v237_v15 }
  0x22   : > { %824 = vmatmul.mubr.msk.f32.gmra.mrb[4].mxu0 %vm245_vm0, %v230_v16 }
  0x23   : > { %826 = vmatprep.mubr.msk.f32.mxu0 %vm245_vm0, %v231_v17  ;;  %836 = vmatmul.mubr.msk.f32.gmra.mrb[4].mxu1 %vm245_vm0, %v238_v18 }
  0x24   : > { %838 = vmatprep.mubr.msk.f32.mxu1 %vm245_vm0, %v239_v19 }
  0x26   : > { %827 = vmatmul.mubr.msk.f32.gmra.mrb[6].mxu0 %vm245_vm0, %v232_v20 }
  0x27   : > { %839 = vmatmul.mubr.msk.f32.gmra.mrb[6].mxu1 %vm245_vm0, %v240_v21 }
  0xed   : > { %v819_v22 = vpop.f32.mrb[0].mxu0 }
  0xee   : > { %440 = vst.msk [vmem:[%s1091_s22 + $0x8] sm:$0xff] %vm245_vm0, %v819_v22  ;;  %538 = vrot.lane.b32.xlu0 %v819_v22, %s958_s23  ;;  %v360_v23 = vpop.f32.mrb[1].mxu0  ;;  %v831_v24 = vpop.f32.mrb[0].mxu1 }
  0xef   : > { %439 = vst.msk [vmem:[%s1091_s22] sm:$0xff] %vm245_vm0, %v360_v23  ;;  %448 = vst.msk [vmem:[%s1091_s22 + $0x48] sm:$0xff] %vm245_vm0, %v831_v24  ;;  %v400_v25 = vpop.f32.mrb[1].mxu1 }
  0xf0   : > { %447 = vst.msk [vmem:[%s1091_s22 + $0x40] sm:$0xff] %vm245_vm0, %v400_v25 }
  0xf1   : > { %v822_v26 = vpop.f32.mrb[2].mxu0 }
  0xf2   : > { %442 = vst.msk [vmem:[%s1091_s22 + $0x18] sm:$0xff] %vm245_vm0, %v822_v26  ;;  %536 = vrot.lane.b32.xlu0 %v360_v23, %s958_s23  ;;  %v370_v27 = vpop.f32.mrb[3].mxu0  ;;  %v834_v28 = vpop.f32.mrb[2].mxu1 }
  0xf3   : > { %441 = vst.msk [vmem:[%s1091_s22 + $0x10] sm:$0xff] %vm245_vm0, %v370_v27  ;;  %540 = vrot.lane.b32.xlu1 %v370_v27, %s958_s23  ;;  %450 = vst.msk [vmem:[%s1091_s22 + $0x58] sm:$0xff] %vm245_vm0, %v834_v28  ;;  %v410_v29 = vpop.f32.mrb[3].mxu1 }
  0xf4   : > { %449 = vst.msk [vmem:[%s1091_s22 + $0x50] sm:$0xff] %vm245_vm0, %v410_v29 }
  0xf5   : > { %v825_v30 = vpop.f32.mrb[4].mxu0 }
  0xf6   : > { %552 = vrot.lane.b32.xlu0 %v400_v25, %s958_s23  ;;  %444 = vst.msk [vmem:[%s1091_s22 + $0x28] sm:$0xff] %vm245_vm0, %v825_v30  ;;  %v380_v31 = vpop.f32.mrb[5].mxu0  ;;  %v837_v32 = vpop.f32.mrb[4].mxu1 }
  0xf7   : > { %542 = vrot.lane.b32.xlu1 %v822_v26, %s958_s23  ;;  %443 = vst.msk [vmem:[%s1091_s22 + $0x20] sm:$0xff] %vm245_vm0, %v380_v31  ;;  %452 = vst.msk [vmem:[%s1091_s22 + $0x68] sm:$0xff] %vm245_vm0, %v837_v32  ;;  %v420_v33 = vpop.f32.mrb[5].mxu1 }
  0xf8   : > { %451 = vst.msk [vmem:[%s1091_s22 + $0x60] sm:$0xff] %vm245_vm0, %v420_v33 }
  0xf9   : > { %v828_v34 = vpop.f32.mrb[6].mxu0 }
  0xfa   : > { %544 = vrot.lane.b32.xlu0 %v380_v31, %s958_s23  ;;  %446 = vst.msk [vmem:[%s1091_s22 + $0x38] sm:$0xff] %vm245_vm0, %v828_v34  ;;  %v840_v35 = vpop.f32.mrb[6].mxu1  ;;  %v390_v36 = vpop.f32.mrb[7].mxu0 }
  0xfb   : > { %546 = vrot.lane.b32.xlu1 %v825_v30, %s958_s23  ;;  %454 = vst.msk [vmem:[%s1091_s22 + $0x78] sm:$0xff] %vm245_vm0, %v840_v35  ;;  %445 = vst.msk [vmem:[%s1091_s22 + $0x30] sm:$0xff] %vm245_vm0, %v390_v36  ;;  %v430_v37 = vpop.f32.mrb[7].mxu1 }
  0xfc   : > { %453 = vst.msk [vmem:[%s1091_s22 + $0x70] sm:$0xff] %vm245_vm0, %v430_v37  ;;  %s900_s22 = scalar_lea.vmem %s899_s19, 64 }
  0xfd   : > { %p902_p1 = scmp.lt.s32.totalorder %s900_s22, %s894_s14 }
  0xfe   : > { %556 = vrot.lane.b32.xlu0 %v410_v29, %s958_s23 }
  0xff   : > { %550 = vrot.lane.b32.xlu1 %v828_v34, %s958_s23  ;;  %p903_p2 = por %p902_p1, %p901_p0 }
 0x101   : > { %p904_p3 = pnand %p903_p2, %p897_p13 }
 0x102   : > { %560 = vrot.lane.b32.xlu0 %v420_v33, %s958_s23 }
 0x103   : > { %554 = vrot.lane.b32.xlu1 %v831_v24, %s958_s23 }
 0x106   : > { %471 = vrot.lane.b32.xlu0 %v360_v23, %s959_s27 }
 0x107   : > { %558 = vrot.lane.b32.xlu1 %v834_v28, %s958_s23 }
 0x10a   : > { %475 = vrot.lane.b32.xlu0 %v370_v27, %s959_s27 }
 0x10b   : > { %562 = vrot.lane.b32.xlu1 %v837_v32, %s958_s23 }
 0x10e   : > { %479 = vrot.lane.b32.xlu0 %v380_v31, %s959_s27 }
 0x10f   : > { %566 = vrot.lane.b32.xlu1 %v840_v35, %s958_s23 }
 0x112   : > { %487 = vrot.lane.b32.xlu0 %v400_v25, %s959_s27 }
 0x113   : > { %473 = vrot.lane.b32.xlu1 %v819_v22, %s959_s27 }
 0x116   : > { %491 = vrot.lane.b32.xlu0 %v410_v29, %s959_s27 }
 0x117   : > { %477 = vrot.lane.b32.xlu1 %v822_v26, %s959_s27 }
 0x11a   : > { %495 = vrot.lane.b32.xlu0 %v420_v33, %s959_s27 }
 0x11b   : > { %481 = vrot.lane.b32.xlu1 %v825_v30, %s959_s27 }
 0x11e   : > { %548 = vrot.lane.b32.xlu0 %v390_v36, %s958_s23 }
 0x11f   : > { %489 = vrot.lane.b32.xlu1 %v831_v24, %s959_s27 }
 0x122   : > { %564 = vrot.lane.b32.xlu0 %v430_v37, %s958_s23 }
 0x123   : > { %493 = vrot.lane.b32.xlu1 %v834_v28, %s959_s27 }
 0x126   : > { %483 = vrot.lane.b32.xlu0 %v390_v36, %s959_s27 }
 0x127   : > { %497 = vrot.lane.b32.xlu1 %v837_v32, %s959_s27 }
 0x12a   : > { %499 = vrot.lane.b32.xlu0 %v430_v37, %s959_s27 }
 0x12b   : > { %485 = vrot.lane.b32.xlu1 %v828_v34, %s959_s27 }
 0x12f   : > { %501 = vrot.lane.b32.xlu1 %v840_v35, %s959_s27 }
 0x160   : > { %v539_v38 = vpop.permute.xlu0 %538 }
 0x164   : > { %v537_v39 = vpop.permute.xlu0 %536 }
 0x165   : > { %v541_v40 = vpop.permute.xlu1 %540  ;;  %584 = vxpose.xlu0.b32.start [1/16] (narrow) %v537_v39, 8 }
 0x168   : > { %v553_v41 = vpop.permute.xlu0 %552 }
 0x169   : > { %v543_v42 = vpop.permute.xlu1 %542  ;;  %585 = vxpose.xlu0.b32.cont [2/16] (narrow) %v539_v38, 8 }
 0x16c   : > { %v545_v43 = vpop.permute.xlu0 %544 }
 0x16d   : > { %v547_v44 = vpop.permute.xlu1 %546  ;;  %586 = vxpose.xlu0.b32.cont [3/16] (narrow) %v541_v40, 8 }
 0x170   : > { %v557_v45 = vpop.permute.xlu0 %556 }
 0x171   : > { %v551_v46 = vpop.permute.xlu1 %550  ;;  %587 = vxpose.xlu0.b32.cont [4/16] (narrow) %v543_v42, 8 }
 0x174   : > { %v561_v47 = vpop.permute.xlu0 %560 }
 0x175   : > { %v555_v48 = vpop.permute.xlu1 %554  ;;  %588 = vxpose.xlu0.b32.cont [5/16] (narrow) %v545_v43, 8 }
 0x178   : > { %v472_v49 = vpop.permute.xlu0 %471 }
 0x179   : > { %520 = vst.msk [vmem:[%s1145_s30] sm:$0xff] %vm519_vm1, %v472_v49  ;;  %v559_v50 = vpop.permute.xlu1 %558  ;;  %589 = vxpose.xlu0.b32.cont [6/16] (narrow) %v547_v44, 8 }
 0x17c   : > { %v476_v51 = vpop.permute.xlu0 %475 }
 0x17d   : > { %522 = vst.msk [vmem:[%s1145_s30 + $0x10] sm:$0xff] %vm519_vm1, %v476_v51  ;;  %v563_v52 = vpop.permute.xlu1 %562 }
 0x180   : > { %v480_v53 = vpop.permute.xlu0 %479 }
 0x181   : > { %524 = vst.msk [vmem:[%s1145_s30 + $0x20] sm:$0xff] %vm519_vm1, %v480_v53  ;;  %v567_v54 = vpop.permute.xlu1 %566 }
 0x184   : > { %v488_v55 = vpop.permute.xlu0 %487 }
 0x185   : > { %528 = vst.msk [vmem:[%s1145_s30 + $0x40] sm:$0xff] %vm519_vm1, %v488_v55  ;;  %v474_v56 = vpop.permute.xlu1 %473 }
 0x186   : > { %521 = vst.msk [vmem:[%s1145_s30 + $0x8] sm:$0xff] %vm519_vm1, %v474_v56 }
 0x188   : > { %v492_v57 = vpop.permute.xlu0 %491 }
 0x189   : > { %530 = vst.msk [vmem:[%s1145_s30 + $0x50] sm:$0xff] %vm519_vm1, %v492_v57  ;;  %v478_v58 = vpop.permute.xlu1 %477 }
 0x18a   : > { %523 = vst.msk [vmem:[%s1145_s30 + $0x18] sm:$0xff] %vm519_vm1, %v478_v58 }
 0x18c   : > { %v496_v59 = vpop.permute.xlu0 %495 }
 0x18d   : > { %532 = vst.msk [vmem:[%s1145_s30 + $0x60] sm:$0xff] %vm519_vm1, %v496_v59  ;;  %v482_v60 = vpop.permute.xlu1 %481 }
 0x18e   : > { %525 = vst.msk [vmem:[%s1145_s30 + $0x28] sm:$0xff] %vm519_vm1, %v482_v60 }
 0x190   : > { %v549_v61 = vpop.permute.xlu0 %548 }
 0x191   : > { %v490_v62 = vpop.permute.xlu1 %489  ;;  %590 = vxpose.xlu0.b32.cont [7/16] (narrow) %v549_v61, 8 }
 0x192   : > { %529 = vst.msk [vmem:[%s1145_s30 + $0x48] sm:$0xff] %vm519_vm1, %v490_v62 }
 0x194   : > { %v565_v63 = vpop.permute.xlu0 %564 }
 0x195   : > { %v494_v0 = vpop.permute.xlu1 %493  ;;  %591 = vxpose.xlu0.b32.cont [8/16] (narrow) %v551_v46, 8 }
 0x196   : > { %531 = vst.msk [vmem:[%s1145_s30 + $0x58] sm:$0xff] %vm519_vm1, %v494_v0 }
 0x198   : > { %v484_v1 = vpop.permute.xlu0 %483 }
 0x199   : > { %526 = vst.msk [vmem:[%s1145_s30 + $0x30] sm:$0xff] %vm519_vm1, %v484_v1  ;;  %v498_v2 = vpop.permute.xlu1 %497  ;;  %592 = vxpose.xlu0.b32.cont [9/16] (narrow) %v553_v41, 8 }
 0x19a   : > { %533 = vst.msk [vmem:[%s1145_s30 + $0x68] sm:$0xff] %vm519_vm1, %v498_v2 }
 0x19c   : > { %v500_v3 = vpop.permute.xlu0 %499 }
 0x19d   : > { %v486_v4 = vpop.permute.xlu1 %485  ;;  %593 = vxpose.xlu0.b32.cont [10/16] (narrow) %v555_v48, 8  ;;  %534 = vst.msk [vmem:[%s1145_s30 + $0x70] sm:$0xff] %vm519_vm1, %v500_v3 }
 0x19e   : > { %527 = vst.msk [vmem:[%s1145_s30 + $0x38] sm:$0xff] %vm519_vm1, %v486_v4 }
 0x1a1   : > { %594 = vxpose.xlu0.b32.cont [11/16] (narrow) %v557_v45, 8  ;;  %v502_v5 = vpop.permute.xlu1 %501 }
 0x1a2   : > { %535 = vst.msk [vmem:[%s1145_s30 + $0x78] sm:$0xff] %vm519_vm1, %v502_v5 }
 0x1a5   : > { %595 = vxpose.xlu0.b32.cont [12/16] (narrow) %v559_v50, 8 }
 0x1a9   : > { %596 = vxpose.xlu0.b32.cont [13/16] (narrow) %v561_v47, 8 }
 0x1ad   : > { %597 = vxpose.xlu0.b32.cont [14/16] (narrow) %v563_v52, 8 }
 0x1b1   : > { %598 = vxpose.xlu0.b32.cont [15/16] (narrow) %v565_v63, 8 }
 0x1b5   : > { %599 = vxpose.xlu0.b32.end [16/16] (narrow) %v567_v54, 8 }
 0x1f9   : > { %v600_v6 = vpop.trf.xlu0 }
 0x1fa   : > { %616 = vst [vmem:[%s206_s7] sm:$0x3] %v600_v6 }
 0x1fb   : > { %907 = shalt.err (!%p904_p3)
}
 0x1fc   : > { %s908_s23 = scalar_lea.hbm %s1186_s12, 32  ;;  %s912_s29 = scalar_lea.hbm %s1230_s4, 64 }
 0x1fd   : > { %p909_p4 = scmp.ne.s32.totalorder %s1186_s12, %s908_s23  ;;  %p913_p9 = scmp.lt.u32.totalorder %s1186_s12, %s1230_s4 }
 0x1fe   : > { %p914_p10 = scmp.lt.u32.totalorder %s912_s29, %s908_s23  ;;  %p916_p12 = scmp.lt.u32.totalorder %s908_s23, %s1186_s12 }
 0x1ff   : > { %p910_p7 = pnand %p909_p4, %p1024_p5 }
 0x200   : > { %p915_p11 = por %p914_p10, %p913_p9 }
 0x201   : > { %p911_p8 = pneg %p910_p7 }
 0x202   : > { %p917_p13 = por %p916_p12, %p915_p11 }
 0x204   : > { %p918_p0 = pnand %p917_p13, %p911_p8 }
 0x206   : > { %921 = shalt.err (!%p918_p0)
}
 0x207   : > { %853 = dma.vmem_to_hbm [thread:$0]  (%p1024_p5), %s1181_s8, 32, %s1186_s12, %s628_s13  }
 0x208 PF: > { %p859_p1 = scmp.ge.s32.totalorder %s956_s18, 2  ;;  %s677_s6 = sand.u32 1, %s944_s15  }
 0x209   : > { %s678_s7 = scalar_lea.sflag [#allocation3], %s677_s6 }
 0x20a   : > { %p856_p2 = pnand %p859_p1, %p1028_p6 }
 0x20c   : > { %939 = dma.done.wait (!%p856_p2), %s678_s7, 32  }
 0x20d   : > { %941 = vsyncadd (!%p856_p2), %s678_s7, 4294967264  ;;  %p15_p3 = scmp.ge.s32.totalorder %s1011_s21, 4   ;;  %s1233_s15 = smov %s948_s16 }
 0x20e   : > { %s1234_s16 = smov %s952_s17  ;;  %s1235_s17 = smov %s1022_s24 }
 0x20f   : > { %s1236_s18 = smov %s1011_s21  ;;  %17 = sbr.rel (!%p15_p3) target bundleno = 3 (0x3), region = 87 }
 0x216   :  { %683 = vsyncpa [#allocation3], 1 }
 0x217   :  { %685 = vsyncpa [#allocation3 + $0x1], 1 }

</bundles_post_ra>
